<compile_context>
chip_gen: v7x
topology: tpu7x:2x2x1
jax: 0.10.0
libtpu: 0.0.40
codegen_flags: <defaults>
</compile_context>

<pallas_src>
import math
from functools import partial

import jax
import jax.numpy as jnp
from jax.experimental import pallas as pl
from jax.experimental.pallas import tpu as pltpu

# Small shapes consistent with the module: pooled hidden states (B, H).
B = 8            # batch (one full sublane group)
H = 64           # config.hidden_size
H2 = 2 * H       # hidden_size * 2 (head's intermediate width, lane-dense 128)
L = 128          # num_labels (lane-dense stand-in)
EPS = 1e-12      # nn.LayerNorm eps
INV_SQRT2 = 1.0 / math.sqrt(2.0)


# ---------------------------------------------------------------------------
# kernel: the whole head in one invocation
# ---------------------------------------------------------------------------
def answer_head_kernel(x_ref, w1_ref, b1_ref, g_ref, be_ref, w2_ref, b2_ref,
                       out_ref):
    x = x_ref[...]                                            # (B, H) f32

    # ---- Linear(H -> 2H): bf16 operands, f32 accumulation on the MXU ----
    h = jnp.dot(x.astype(jnp.bfloat16), w1_ref[...].astype(jnp.bfloat16),
                preferred_element_type=jnp.float32) + b1_ref[...]

    # ---- GeLU (exact erf form, matches HF `gelu`) -- f32 on VPU/EUP ----
    h = 0.5 * h * (1.0 + jax.lax.erf(h * INV_SQRT2))

    # ---- LayerNorm(2H, eps=1e-12) -- f32, rsqrt on the EUP ----
    mu = jnp.mean(h, axis=-1, keepdims=True)
    hc = h - mu
    var = jnp.mean(hc * hc, axis=-1, keepdims=True)
    h = hc * jax.lax.rsqrt(var + EPS) * g_ref[...] + be_ref[...]

    # ---- Linear(2H -> num_labels): bf16 operands, f32 accumulate ----
    out_ref[...] = jnp.dot(h.astype(jnp.bfloat16),
                           w2_ref[...].astype(jnp.bfloat16),
                           preferred_element_type=jnp.float32) + b2_ref[...]


# ---------------------------------------------------------------------------
# wrapper
# ---------------------------------------------------------------------------
@jax.jit
def visual_answer_head(x, params):
    w1, b1, g, be, w2, b2 = params
    # Present vector params as (1, N) rows: 2-D, lane-major, broadcast against
    # the (B, N) activations with no in-kernel relayout.
    b1r = b1.reshape(1, -1)
    gr = g.reshape(1, -1)
    ber = be.reshape(1, -1)
    b2r = b2.reshape(1, -1)

    vmem = pltpu.MemorySpace.VMEM
    in_specs = [pl.BlockSpec(memory_space=vmem) for _ in range(7)]
    out_spec = pl.BlockSpec(memory_space=vmem)

    bsz = x.shape[0]
    cost = pl.CostEstimate(
        flops=2 * bsz * H * H2 + 2 * bsz * H2 * L,
        transcendentals=bsz * H2,          # erf per intermediate element
        bytes_accessed=4 * (x.size + w1.size + b1.size + g.size + be.size
                            + w2.size + b2.size + bsz * L),
    )

    return pl.pallas_call(
        answer_head_kernel,
        out_shape=jax.ShapeDtypeStruct((bsz, L), jnp.float32),
        in_specs=in_specs,
        out_specs=out_spec,
        cost_estimate=cost,
    )(x, w1, b1r, gr, ber, w2, b2r)


# ---------------------------------------------------------------------------
# pure-JAX f32 reference (same math as the PyTorch module, eval mode)
# ---------------------------------------------------------------------------
def visual_answer_head_ref(x, params):
    w1, b1, g, be, w2, b2 = params
    h = x @ w1 + b1
    h = 0.5 * h * (1.0 + jax.lax.erf(h * INV_SQRT2))
    mu = jnp.mean(h, axis=-1, keepdims=True)
    var = jnp.mean((h - mu) ** 2, axis=-1, keepdims=True)
    h = (h - mu) / jnp.sqrt(var + EPS) * g + be
    return h @ w2 + b2


def make_params(key):
    k1, k2, k3, k4 = jax.random.split(key, 4)
    w1 = jax.random.normal(k1, (H, H2), jnp.float32) * 0.05
    b1 = jax.random.normal(k2, (H2,), jnp.float32) * 0.01
    g = jnp.ones((H2,), jnp.float32)
    be = jnp.zeros((H2,), jnp.float32)
    w2 = jax.random.normal(k3, (H2, L), jnp.float32) * 0.05
    b2 = jax.random.normal(k4, (L,), jnp.float32) * 0.01
    return (w1, b1, g, be, w2, b2)


if __name__ == "__main__":
    key = jax.random.PRNGKey(0)
    kx, kp = jax.random.split(key)

    x = jax.random.normal(kx, (B, H), jnp.float32)   # pooled hidden states
    params = make_params(kp)

    out = jax.block_until_ready(visual_answer_head(x, params))
    ref = visual_answer_head_ref(x, params)

    assert out.shape == (B, L), out.shape
    # bf16 MXU operands vs f32 reference -> relaxed tolerance.
    max_err = float(jnp.max(jnp.abs(out - ref)))
    assert jnp.allclose(out, ref, atol=2e-2, rtol=2e-2), max_err

    print("KERNEL_OK")
</pallas_src>

<mosaic_0001>
module attributes {stable_mosaic.version = 11 : i64} {
  func.func @answer_head_kernel(%arg0: memref<8x64xf32, #tpu.memory_space<vmem>>, %arg1: memref<64x128xf32, #tpu.memory_space<vmem>>, %arg2: memref<1x128xf32, #tpu.memory_space<vmem>>, %arg3: memref<1x128xf32, #tpu.memory_space<vmem>>, %arg4: memref<1x128xf32, #tpu.memory_space<vmem>>, %arg5: memref<128x128xf32, #tpu.memory_space<vmem>>, %arg6: memref<1x128xf32, #tpu.memory_space<vmem>>, %arg7: memref<8x128xf32, #tpu.memory_space<vmem>>) attributes {dimension_semantics = [], scalar_prefetch = 0 : i64, scratch_operands = 0 : i64, tpu.core_type = #tpu.core_type<tc>} {
    %c0 = arith.constant 0 : index
    %c0_0 = arith.constant 0 : index
    %0 = vector.load %arg0[%c0, %c0_0] : memref<8x64xf32, #tpu.memory_space<vmem>>, vector<8x64xf32>
    %1 = arith.truncf %0 : vector<8x64xf32> to vector<8x64xbf16>
    %c0_1 = arith.constant 0 : index
    %c0_2 = arith.constant 0 : index
    %2 = vector.load %arg1[%c0_1, %c0_2] : memref<64x128xf32, #tpu.memory_space<vmem>>, vector<64x128xf32>
    %3 = arith.truncf %2 : vector<64x128xf32> to vector<64x128xbf16>
    %cst = arith.constant dense<0.000000e+00> : vector<8x128xf32>
    %4 = tpu.matmul %1, %3, %cst {dimension_numbers = #tpu.dot_dimension_numbers<[1], [0], [0], [1], [0, 0, 1, 1], [], []>} : vector<8x64xbf16>, vector<64x128xbf16>, vector<8x128xf32> -> vector<8x128xf32>
    %c0_3 = arith.constant 0 : index
    %c0_4 = arith.constant 0 : index
    %5 = vector.load %arg2[%c0_3, %c0_4] : memref<1x128xf32, #tpu.memory_space<vmem>>, vector<1x128xf32>
    %6 = vector.broadcast %5 : vector<1x128xf32> to vector<8x128xf32>
    %7 = arith.addf %4, %6 : vector<8x128xf32>
    %cst_5 = arith.constant 5.000000e-01 : f32
    %8 = vector.broadcast %cst_5 : f32 to vector<8x128xf32>
    %9 = arith.mulf %8, %7 : vector<8x128xf32>
    %cst_6 = arith.constant 0.707106769 : f32
    %10 = vector.broadcast %cst_6 : f32 to vector<8x128xf32>
    %11 = arith.mulf %7, %10 : vector<8x128xf32>
    %12 = math.erf %11 : vector<8x128xf32>
    %cst_7 = arith.constant 1.000000e+00 : f32
    %13 = vector.broadcast %cst_7 : f32 to vector<8x128xf32>
    %14 = arith.addf %13, %12 : vector<8x128xf32>
    %15 = arith.mulf %9, %14 : vector<8x128xf32>
    %cst_8 = arith.constant dense<0.000000e+00> : vector<8xf32>
    %16 = vector.multi_reduction <add>, %15, %cst_8 [1] : vector<8x128xf32> to vector<8xf32>
    %17 = vector.shape_cast %16 : vector<8xf32> to vector<8x1xf32>
    %cst_9 = arith.constant 1.280000e+02 : f32
    %18 = vector.broadcast %cst_9 : f32 to vector<8x1xf32>
    %19 = arith.divf %17, %18 : vector<8x1xf32>
    %20 = vector.broadcast %19 : vector<8x1xf32> to vector<8x128xf32>
    %21 = arith.subf %15, %20 : vector<8x128xf32>
    %22 = arith.mulf %21, %21 : vector<8x128xf32>
    %cst_10 = arith.constant dense<0.000000e+00> : vector<8xf32>
    %23 = vector.multi_reduction <add>, %22, %cst_10 [1] : vector<8x128xf32> to vector<8xf32>
    %24 = vector.shape_cast %23 : vector<8xf32> to vector<8x1xf32>
    %cst_11 = arith.constant 1.280000e+02 : f32
    %25 = vector.broadcast %cst_11 : f32 to vector<8x1xf32>
    %26 = arith.divf %24, %25 : vector<8x1xf32>
    %cst_12 = arith.constant 9.99999996E-13 : f32
    %27 = vector.broadcast %cst_12 : f32 to vector<8x1xf32>
    %28 = arith.addf %26, %27 : vector<8x1xf32>
    %29 = math.rsqrt %28 : vector<8x1xf32>
    %30 = vector.broadcast %29 : vector<8x1xf32> to vector<8x128xf32>
    %31 = arith.mulf %21, %30 : vector<8x128xf32>
    %c0_13 = arith.constant 0 : index
    %c0_14 = arith.constant 0 : index
    %32 = vector.load %arg3[%c0_13, %c0_14] : memref<1x128xf32, #tpu.memory_space<vmem>>, vector<1x128xf32>
    %33 = vector.broadcast %32 : vector<1x128xf32> to vector<8x128xf32>
    %34 = arith.mulf %31, %33 : vector<8x128xf32>
    %c0_15 = arith.constant 0 : index
    %c0_16 = arith.constant 0 : index
    %35 = vector.load %arg4[%c0_15, %c0_16] : memref<1x128xf32, #tpu.memory_space<vmem>>, vector<1x128xf32>
    %36 = vector.broadcast %35 : vector<1x128xf32> to vector<8x128xf32>
    %37 = arith.addf %34, %36 : vector<8x128xf32>
    %38 = arith.truncf %37 : vector<8x128xf32> to vector<8x128xbf16>
    %c0_17 = arith.constant 0 : index
    %c0_18 = arith.constant 0 : index
    %39 = vector.load %arg5[%c0_17, %c0_18] : memref<128x128xf32, #tpu.memory_space<vmem>>, vector<128x128xf32>
    %40 = arith.truncf %39 : vector<128x128xf32> to vector<128x128xbf16>
    %cst_19 = arith.constant dense<0.000000e+00> : vector<8x128xf32>
    %41 = tpu.matmul %38, %40, %cst_19 {dimension_numbers = #tpu.dot_dimension_numbers<[1], [0], [0], [1], [0, 0, 1, 1], [], []>} : vector<8x128xbf16>, vector<128x128xbf16>, vector<8x128xf32> -> vector<8x128xf32>
    %c0_20 = arith.constant 0 : index
    %c0_21 = arith.constant 0 : index
    %42 = vector.load %arg6[%c0_20, %c0_21] : memref<1x128xf32, #tpu.memory_space<vmem>>, vector<1x128xf32>
    %43 = vector.broadcast %42 : vector<1x128xf32> to vector<8x128xf32>
    %44 = arith.addf %41, %43 : vector<8x128xf32>
    %c0_22 = arith.constant 0 : index
    %c0_23 = arith.constant 0 : index
    %45 = vector.load %arg7[%c0_22, %c0_23] : memref<8x128xf32, #tpu.memory_space<vmem>>, vector<8x128xf32>
    tpu.vector_store %arg7[%c0_22, %c0_23], %44 {strides = array<i32>} : memref<8x128xf32, #tpu.memory_space<vmem>>, vector<8x128xf32>,
    return
  }
}

</mosaic_0001>

<bundles_post_ra>
// kernel: visual_answer_head.1
= control target key start
LH: loop header
LB: loop body
LE: loop exit
PB: predicated region body
PF: predicated region fallthrough
CT: control target
= control target key end

     0   :  { %12 = vsyncpa [#allocation3], 0  ;;  %s489_s0 = inlined_call_operand.vmem [shape: f32[8,64], index: 0, kind: input, shape index: {}]   ;;  %s490_s1 = inlined_call_operand.hbm [shape: f32[64,128], index: 1, kind: input, shape index: {}]   ;;  %s491_s2 = inlined_call_operand.vmem [shape: f32[1,128], index: 2, kind: input, shape index: {}]   ;;  %s492_s3 = inlined_call_operand.vmem [shape: f32[1,128], index: 3, kind: input, shape index: {}]   ;;  %s493_s4 = inlined_call_operand.vmem [shape: f32[1,128], index: 4, kind: input, shape index: {}]   ;;  %s494_s5 = inlined_call_operand.hbm [shape: f32[128,128], index: 5, kind: input, shape index: {}]   ;;  %s495_s6 = inlined_call_operand.vmem [shape: f32[1,128], index: 6, kind: input, shape index: {}]   ;;  %s496_s7 = inlined_call_operand.hbm [shape: f32[8,128], index: 7, kind: output, shape index: {}]  }
   0x1   :  { %13 = vsyncpa [#allocation6], 0 }
   0x2   :  { %14 = vsyncpa [#allocation4], 0  ;;  %s377_s24 = smov [#allocation2]   ;;  %s305_s28 = scalar_lea.hbm %s490_s1, 1024 }
   0x3   :  { %s22_s25 = sshll.u32 %s377_s24, 4  ;;  %p306_p0 = scmp.ne.s32.totalorder %s490_s1, %s305_s28  ;;  %s23_s25 = int_to_ptr.vmem [resolvable:$true] %s22_s25 }
   0x4   :  { %p309_p1 = scmp.lt.u32.totalorder %s305_s28, %s490_s1 }
   0x6   :  { %p311_p2 = pnand %p309_p1, %p306_p0 }
   0x8   :  { %314 = shalt.err (!%p311_p2)
}
   0x9   :  { %s315_s10 = scalar_lea.vmem %s23_s25, 1024  ;;  %p320_p4 = scmp.lt.s32.totalorder %s23_s25, %s23_s25 }
   0xa   :  { %p316_p3 = scmp.ne.s32.totalorder %s23_s25, %s315_s10  ;;  %p321_p5 = scmp.lt.s32.totalorder %s315_s10, %s315_s10 }
   0xc   :  { %p322_p6 = por %p321_p5, %p320_p4 }
   0xe   :  { %p323_p7 = pnand %p322_p6, %p316_p3 }
  0x10   :  { %326 = shalt.err (!%p323_p7)
}
  0x11   :  { %s378_s11 = smov 128   ;;  %s379_s12 = smov 8  }
  0x12   :  { %28 = dma.hbm_to_vmem [thread:$0]  %s490_s1, 1024, %s23_s25, [#allocation3], %s378_s11, %s378_s11, %s379_s12  }
  0x13   :  { %s380_s15 = smov [#allocation5]   ;;  %s327_s19 = scalar_lea.hbm %s494_s5, 2048 }
  0x14   :  { %s40_s16 = sshll.u32 %s380_s15, 4  ;;  %p328_p8 = scmp.ne.s32.totalorder %s494_s5, %s327_s19  ;;  %s41_s16 = int_to_ptr.vmem [resolvable:$true] %s40_s16 }
  0x15   :  { %p331_p9 = scmp.lt.u32.totalorder %s327_s19, %s494_s5 }
  0x17   :  { %p333_p10 = pnand %p331_p9, %p328_p8 }
  0x19   :  { %336 = shalt.err (!%p333_p10)
}
  0x1a   :  { %s337_s24 = scalar_lea.vmem %s41_s16, 2048  ;;  %p342_p12 = scmp.lt.s32.totalorder %s41_s16, %s41_s16 }
  0x1b   :  { %p338_p11 = scmp.ne.s32.totalorder %s41_s16, %s337_s24  ;;  %p343_p13 = scmp.lt.s32.totalorder %s337_s24, %s337_s24 }
  0x1d   :  { %p344_p0 = por %p343_p13, %p342_p12 }
  0x1f   :  { %p345_p1 = pnand %p344_p0, %p338_p11 }
  0x21   :  { %348 = shalt.err (!%p345_p1)
}
  0x22   :  { %46 = dma.hbm_to_vmem [thread:$0]  %s494_s5, 2048, %s41_s16, [#allocation6], %s378_s11, %s378_s11, %s379_s12  }
  0x23   :  { %371 = dma.done.wait [#allocation3], 1024  }
  0x24   :  { %372 = vsyncadd [#allocation3], 4294966272 }
  0x25   :  { %373 = dma.done.wait [#allocation6], 2048  }
  0x26   :  { %374 = vsyncadd [#allocation6], 4294965248  ;;  %v381_v0 = vmov 0.0   ;;  %vm382_vm0 = vmmov 0   ;;  %v58_v1 = vld [vmem:[#allocation2] sm:$0xff]  ;;  %v59_v2 = vld [vmem:[#allocation2 + $0x8] sm:$0xff] }
  0x27   :  { %262 = vmatprep.subr.bf16.mxu0 %v381_v0  ;;  %270 = vmatprep.mubr.msk.bf16.mxu0 %vm382_vm0, %v381_v0  ;;  %v60_v3 = vld [vmem:[#allocation2 + $0x10] sm:$0xff]  ;;  %v66_v4 = vpack.c.bf16 %v59_v2, %v58_v1  ;;  %v61_v5 = vld [vmem:[#allocation2 + $0x18] sm:$0xff]  ;;  %v62_v7 = vld [vmem:[#allocation2 + $0x20] sm:$0xff]  ;;  %vm77_vm1 = vcmask 523264   ;;  %s383_s10 = smov [#allocation7]  }
  0x28   :  { %274 = vmatprep.subr.bf16.mxu1 %v381_v0  ;;  %290 = vmatprep.mubr.msk.bf16.mxu1 %vm382_vm0, %v381_v0  ;;  %v67_v6 = vpack.c.bf16 %v61_v5, %v60_v3  ;;  %v63_v8 = vld [vmem:[#allocation2 + $0x28] sm:$0xff]  ;;  %v64_v10 = vld [vmem:[#allocation2 + $0x30] sm:$0xff]  ;;  %v65_v11 = vld [vmem:[#allocation2 + $0x38] sm:$0xff]  ;;  %s233_s11 = sshll.u32 %s383_s10, 4  ;;  %s234_s11 = int_to_ptr.vmem [resolvable:$true] %s233_s11 }
  0x29   :  { %263 = vmatpush3.bf16.msra.mxu0 %v66_v4  ;;  %v68_v9 = vpack.c.bf16 %v63_v8, %v62_v7  ;;  %v69_v12 = vpack.c.bf16 %v65_v11, %v64_v10  ;;  %v56_v13 = vld [vmem:[%s489_s0] sm:$0xff]  ;;  %v156_v27 = vld [vmem:[#allocation5 + $0x8] sm:$0xff]  ;;  %v157_v28 = vld [vmem:[#allocation5 + $0x10] sm:$0xff]  ;;  %p354_p3 = scmp.lt.s32.totalorder %s234_s11, %s234_s11 }
  0x2a   :  { %264 = vmatprep.subr.bf16.mxu0 %v381_v0  ;;  %v57_v14 = vpack.c.bf16 %v56_v13, %v56_v13  ;;  %v243_v15 = vld [vmem:[%s491_s2] ss:$0 sm:$0xff]  ;;  %v158_v30 = vld [vmem:[#allocation5 + $0x18] sm:$0xff]  ;;  %v160_v37 = vld [vmem:[#allocation5 + $0x28] sm:$0xff] }
  0x2b   :  { %v155_v26 = vld [vmem:[#allocation5] sm:$0xff]  ;;  %v172_v31 = vpack.c.bf16 %v158_v30, %v157_v28  ;;  %v161_v39 = vld [vmem:[#allocation5 + $0x30] sm:$0xff]  ;;  %v162_v40 = vld [vmem:[#allocation5 + $0x38] sm:$0xff] }
  0x2c   :  { %v171_v29 = vpack.c.bf16 %v156_v27, %v155_v26  ;;  %v159_v36 = vld [vmem:[#allocation5 + $0x20] sm:$0xff]  ;;  %v174_v41 = vpack.c.bf16 %v162_v40, %v161_v39  ;;  %v164_v43 = vld [vmem:[#allocation5 + $0x48] sm:$0xff]  ;;  %v165_v45 = vld [vmem:[#allocation5 + $0x50] sm:$0xff] }
  0x2d   :  { %265 = vmatpush3.bf16.msra.mxu0 %v67_v6  ;;  %v173_v38 = vpack.c.bf16 %v160_v37, %v159_v36  ;;  %v163_v42 = vld [vmem:[#allocation5 + $0x40] sm:$0xff]  ;;  %v166_v46 = vld [vmem:[#allocation5 + $0x58] sm:$0xff]  ;;  %v168_v49 = vld [vmem:[#allocation5 + $0x68] sm:$0xff] }
  0x2e   :  { %266 = vmatprep.subr.bf16.mxu0 %v381_v0  ;;  %275 = vmatpush3.bf16.msra.mxu1 %v171_v29  ;;  %v175_v44 = vpack.c.bf16 %v164_v43, %v163_v42  ;;  %v176_v47 = vpack.c.bf16 %v166_v46, %v165_v45  ;;  %v167_v48 = vld [vmem:[#allocation5 + $0x60] sm:$0xff]  ;;  %v169_v51 = vld [vmem:[#allocation5 + $0x70] sm:$0xff]  ;;  %v170_v52 = vld [vmem:[#allocation5 + $0x78] sm:$0xff] }
  0x2f   :  { %276 = vmatprep.subr.bf16.mxu1 %v381_v0  ;;  %v177_v50 = vpack.c.bf16 %v168_v49, %v167_v48  ;;  %v178_v53 = vpack.c.bf16 %v170_v52, %v169_v51  ;;  %v245_v58 = vld [vmem:[%s492_s3] ss:$0 sm:$0xff]  ;;  %s349_s3 = scalar_lea.vmem %s234_s11, 128 }
  0x30   :  { %v246_v60 = vld [vmem:[%s493_s4] ss:$0 sm:$0xff]  ;;  %p350_p2 = scmp.ne.s32.totalorder %s234_s11, %s349_s3  ;;  %p355_p4 = scmp.lt.s32.totalorder %s349_s3, %s349_s3 }
  0x31   :  { %267 = vmatpush3.bf16.msra.mxu0 %v68_v9 }
  0x32   :  { %268 = vmatprep.subr.bf16.mxu0 %v381_v0  ;;  %277 = vmatpush3.bf16.msra.mxu1 %v172_v31  ;;  %p356_p5 = por %p355_p4, %p354_p3 }
  0x33   :  { %278 = vmatprep.subr.bf16.mxu1 %v381_v0 }
  0x34   :  { %p357_p6 = pnand %p356_p5, %p350_p2 }
  0x35   :  { %269 = vmatpush3.bf16.msra.mxu0 %v69_v12 }
  0x36   :  { %279 = vmatpush3.bf16.msra.mxu1 %v173_v38 }
  0x37   :  { %280 = vmatprep.subr.bf16.mxu1 %v381_v0 }
  0x38   :  { %271 = vmatmul.mubr.msk.bf16.vlgmr.msra.gmra.mrb[0].mxu0 %vm77_vm1, %v57_v14 }
  0x3a   :  { %281 = vmatpush3.bf16.msra.mxu1 %v174_v41 }
  0x3b   :  { %282 = vmatprep.subr.bf16.mxu1 %v381_v0 }
  0x3e   :  { %283 = vmatpush3.bf16.msra.mxu1 %v175_v44 }
  0x3f   :  { %284 = vmatprep.subr.bf16.mxu1 %v381_v0 }
  0x42   :  { %285 = vmatpush3.bf16.msra.mxu1 %v176_v47 }
  0x43   :  { %286 = vmatprep.subr.bf16.mxu1 %v381_v0 }
  0x46   :  { %287 = vmatpush3.bf16.msra.mxu1 %v177_v50 }
  0x47   :  { %288 = vmatprep.subr.bf16.mxu1 %v381_v0  ;;  %v247_v0 = vld [vmem:[%s495_s6] ss:$0 sm:$0xff] }
  0x4a   :  { %289 = vmatpush3.bf16.msra.mxu1 %v178_v53 }
 0x10b   :  { %v115_v16 = vpop.f32.mrb[0].mxu0 }
 0x10c   :  { %v116_v17 = vadd.f32 %v243_v15, %v115_v16  ;;  %v272_v18 = vpop.f32.mrb[1].mxu0 }
 0x10d   :  { %v118_v19 = vpop.f32.mrb[2].mxu0 }
 0x10e   :  { %v122_v20 = vmul.f32 0.70710677, %v116_v17  ;;  %v273_v21 = vpop.f32.mrb[3].mxu0  ;;  %v121_v23 = vmul.f32 0.5, %v116_v17 }
 0x110   :  { %301 = verf.f32 %v122_v20 }
 0x11a   :  { %v302_v22 = vpop.eup %301 }
 0x11b   :  { %v124_v24 = vadd.f32 1.0, %v302_v22 }
 0x11d   :  { %v125_v25 = vmul.f32 %v124_v24, %v121_v23 }
 0x11f   :  { %126 = vadd.xlane.f32.xlu0 %v125_v25 }
 0x1ac   :  { %v127_v32 = vpop.xlane.xlu0 %126 }
 0x1ad   :  { %v129_v33 = vmul.f32 0.0078125, %v127_v32 }
 0x1af   :  { %v130_v34 = vsub.f32 %v125_v25, %v129_v33 }
 0x1b1   :  { %v131_v35 = vmul.f32 %v130_v34, %v130_v34 }
 0x1b3   :  { %132 = vadd.xlane.f32.xlu0 %v131_v35 }
 0x240   :  { %v133_v54 = vpop.xlane.xlu0 %132 }
 0x241   :  { %v134_v55 = vmul.f32 0.0078125, %v133_v54 }
 0x243   :  { %v135_v56 = vadd.f32 1e-12, %v134_v55 }
 0x245   :  { %303 = vrsqrt.f32 %v135_v56 }
 0x24f   :  { %v304_v57 = vpop.eup %303 }
 0x250   :  { %v137_v59 = vmul.f32 %v304_v57, %v130_v34 }
 0x252   :  { %v145_v61 = vmul.f32 %v245_v58, %v137_v59 }
 0x254   :  { %v153_v62 = vadd.f32 %v246_v60, %v145_v61 }
 0x256   :  { %v154_v63 = vpack.c.bf16 %v153_v62, %v153_v62 }
 0x258   :  { %291 = vmatmul.mubr.bf16.vlgmr.msra.gmra.mrb[0].mxu1 %v154_v63 }
 0x32b   :  { %v220_v1 = vpop.f32.mrb[0].mxu1 }
 0x32c   :  { %v221_v2 = vadd.f32 %v247_v0, %v220_v1  ;;  %v292_v3 = vpop.f32.mrb[1].mxu1 }
 0x32d   :  { %v223_v4 = vpop.f32.mrb[2].mxu1 }
 0x32e   :  { %226 = vst [vmem:[#allocation7] sm:$0xff] %v221_v2  ;;  %v293_v5 = vpop.f32.mrb[3].mxu1 }
 0x32f   :  { %360 = shalt.err (!%p357_p6)
}
 0x330   :  { %s361_s6 = scalar_lea.hbm %s496_s7, 128 }
 0x331   :  { %p362_p7 = scmp.ne.s32.totalorder %s496_s7, %s361_s6  ;;  %p365_p8 = scmp.lt.u32.totalorder %s361_s6, %s496_s7 }
 0x333   :  { %p367_p9 = pnand %p365_p8, %p362_p7 }
 0x335   :  { %370 = shalt.err (!%p367_p9)
}
 0x336   :  { %236 = dma.vmem_to_hbm [thread:$0]  %s234_s11, 128, %s496_s7, [#allocation4]  }
 0x337   :  { %375 = dma.done.wait [#allocation4], 128  }
 0x338   :  { %376 = vsyncadd [#allocation4], 4294967168 }
 0x339   :  { %240 = vsyncpa [#allocation3], 1 }
 0x33a   :  { %241 = vsyncpa [#allocation6], 1 }
 0x33b   :  { %242 = vsyncpa [#allocation4], 1 }

</bundles_post_ra>
